<compile_context>
chip_gen: v6e
topology: v6e:2x2x1
jax: 0.10.0
libtpu: 0.0.40
codegen_flags: <defaults>
</compile_context>

<pallas_src>
import jax
import jax.numpy as jnp
from jax.experimental import pallas as pl
from jax.experimental.pallas import tpu as pltpu


def _upsample_conv_concat_kernel(w_ref, b_ref, x_ref, r_ref, f_ref, o_ref):
    # w_ref : VMEM (Cout, C)        1x1 conv weight == torch weight[:, :, 0, 0]
    # b_ref : VMEM (Cout, 1)        bias
    # x_ref : VMEM (1, C, S_low)    low-res input slab, spatial flattened
    # r_ref : VMEM (1, S_low, S_t)  0/1 nearest-replication matrix (flat tile)
    # f_ref : VMEM (1, Cf, S_t)     featuremap tile, spatial flattened
    # o_ref : VMEM (1, Cout+Cf, S_t)
    Cout = w_ref.shape[0]
    x = x_ref[0].astype(jnp.float32)                                   # (C, S_low)
    # 1x1 conv at LOW resolution (MXU channel contraction); bias folded here.
    y_low = (jnp.dot(w_ref[...], x, preferred_element_type=jnp.float32)
             + b_ref[...])                                             # (Cout, S_low)
    # Batched nearest upsample for all output channels at once; result is
    # already in the flattened (lane-dense) spatial layout of the output tile.
    up = jnp.dot(y_low, r_ref[0], preferred_element_type=jnp.float32)  # (Cout, S_t)
    o_ref[0, :Cout] = up.astype(o_ref.dtype)
    # Fused channel concat: copy the featuremap tile straight into the output.
    o_ref[0, Cout:] = f_ref[0].astype(o_ref.dtype)


def _choose_tiling(N, C, Cout, Cf, Hin, Win, Hout, Wout,
                   x_bytes, f_bytes, out_bytes):
    """Pick the output row tile `th` (divisor of Hout)."""
    Ctot = Cout + Cf
    integer = (Hout % Hin == 0) and (Wout % Win == 0)
    s_h = (Hout // Hin) if integer else 0

    def plan(th):
        s_tile = th * Wout
        if th != Hout and s_tile % 128 != 0:          # keep stores lane-dense
            return None
        x_tiled, hin_t = False, Hin
        if integer and th % s_h == 0:
            ht = th // s_h
            if ht == Hin or (ht * Win) % 128 == 0:    # (8,128)-rule for x block
                x_tiled, hin_t = True, ht
        s_low = hin_t * Win
        vmem = (2 * Ctot * s_tile * out_bytes          # output (double-buffered)
                + 2 * Cf * s_tile * f_bytes            # featuremap tile
                + 2 * C * s_low * x_bytes              # x slab
                + 2 * s_low * s_tile * 4               # replication matrix
                + 4 * Cout * max(s_low, s_tile) * 4    # f32 temporaries
                + (1 << 20))                           # w/b + headroom
        return dict(th=th, s_tile=s_tile, x_tiled=x_tiled,
                    hin_t=hin_t, s_low=s_low, vmem=vmem)

    budget = 20 * 1024 * 1024                          # safe on v5e/v6e/v7x
    plans = [p for p in (plan(th) for th in range(Hout, 0, -1)
                         if Hout % th == 0) if p is not None]
    fitting = [p for p in plans if p["vmem"] <= budget]
    chosen = fitting[0] if fitting else min(plans, key=lambda p: p["vmem"])
    # Megacore: prefer >= 2 parallel grid steps (v7x has 2 TensorCores).
    if N * (Hout // chosen["th"]) < 2:
        for p in (fitting if fitting else plans):
            if N * (Hout // p["th"]) >= 2:
                chosen = p
                break
    return chosen


def upsample_forward(x, featuremap, w, b):
    """Equivalent of Upsample.forward(x, featuremap) (PyTorch NCHW semantics).

    x:          (N, C, Hin, Win)
    featuremap: (N, Cf, Hout, Wout)  with Wout == Hout (torch.cat constraint)
    w:          (Cout, C)   == torch conv1.weight[:, :, 0, 0]
    b:          (Cout,)
    returns     (N, Cout + Cf, Hout, Wout)
    """
    N, C, Hin, Win = x.shape
    Nf, Cf, Hout, Wf = featuremap.shape
    assert Nf == N and Wf == Hout, "featuremap must be square / batch-match"
    Cout = w.shape[0]
    Ctot = Cout + Cf
    Wout = Hout
    out_dtype = x.dtype

    out_bytes = jnp.dtype(out_dtype).itemsize
    plan = _choose_tiling(N, C, Cout, Cf, Hin, Win, Hout, Wout,
                          jnp.dtype(x.dtype).itemsize,
                          jnp.dtype(featuremap.dtype).itemsize, out_bytes)
    th, s_tile, s_low = plan["th"], plan["s_tile"], plan["s_low"]
    n_tiles = Hout // th

    # ---- shape-only 0/1 replication matrix (flat low-res -> flat out tile) ---
    if plan["x_tiled"]:
        # integer scale: one tile-local matrix shared by every grid step
        s_h, s_w = Hout // Hin, Wout // Win
        src = ((jnp.arange(th)[:, None] // s_h) * Win
               + (jnp.arange(Wout)[None, :] // s_w)).reshape(-1)       # (s_tile,)
        r_stack = (src[None, :] == jnp.arange(s_low)[:, None]
                   ).astype(jnp.float32)[None]                         # (1,s_low,s_tile)
        x_in = x.reshape(N, C, Hin * Win)
        x_spec = pl.BlockSpec((1, C, s_low), lambda n, i: (n, 0, i))
        r_spec = pl.BlockSpec((1, s_low, s_tile), lambda n, i: (0, 0, 0))
    else:
        # general nearest mapping: full low-res slab + per-tile matrix stack
        idx_h = (jnp.arange(Hout) * Hin) // Hout
        idx_w = (jnp.arange(Wout) * Win) // Wout
        src = (idx_h[:, None] * Win + idx_w[None, :]).reshape(-1)      # (Hout*Wout,)
        r_full = (src[None, :] == jnp.arange(Hin * Win)[:, None]
                  ).astype(jnp.float32)                                # (s_low, S_out)
        r_stack = r_full.reshape(Hin * Win, n_tiles, s_tile).transpose(1, 0, 2)
        x_in = x.reshape(N, C, Hin * Win)
        x_spec = pl.BlockSpec((1, C, Hin * Win), lambda n, i: (n, 0, 0))
        r_spec = pl.BlockSpec((1, Hin * Win, s_tile), lambda n, i: (i, 0, 0))

    f_in = featuremap.reshape(N, Cf, Hout * Wout)
    w_in = w.astype(jnp.float32)
    b_in = b.reshape(Cout, 1).astype(jnp.float32)

    bytes_accessed = int(x.size * jnp.dtype(x.dtype).itemsize
                         + featuremap.size * jnp.dtype(featuremap.dtype).itemsize
                         + N * Ctot * Hout * Wout * out_bytes
                         + r_stack.size * 4 + w_in.size * 4 + b_in.size * 4)
    cost = pl.CostEstimate(flops=int(2 * N * Hout * Wout * C * Cout),
                           transcendentals=0,
                           bytes_accessed=bytes_accessed)

    out_flat = pl.pallas_call(
        _upsample_conv_concat_kernel,
        out_shape=jax.ShapeDtypeStruct((N, Ctot, Hout * Wout), out_dtype),
        grid_spec=pltpu.PrefetchScalarGridSpec(
            num_scalar_prefetch=0,
            grid=(N, n_tiles),
            in_specs=[
                pl.BlockSpec((Cout, C), lambda n, i: (0, 0)),          # w
                pl.BlockSpec((Cout, 1), lambda n, i: (0, 0)),          # b
                x_spec,                                                # x (flat)
                r_spec,                                                # replication
                pl.BlockSpec((1, Cf, s_tile), lambda n, i: (n, 0, i)), # featuremap
            ],
            out_specs=pl.BlockSpec((1, Ctot, s_tile), lambda n, i: (n, 0, i)),
        ),
        compiler_params=pltpu.CompilerParams(
            dimension_semantics=("parallel", "parallel"),
            vmem_limit_bytes=48 * 1024 * 1024),
        cost_estimate=cost,
    )(w_in, b_in, x_in, r_stack, f_in)

    return out_flat.reshape(N, Ctot, Hout, Wout)


if __name__ == "__main__":
    key = jax.random.PRNGKey(0)
    k_x, k_f, k_w, k_b = jax.random.split(key, 4)

    channel = 4
    N, Hin, Win = 2, 8, 8
    Hout = 16  # featuremap spatial size

    x = jax.random.normal(k_x, (N, channel, Hin, Win), dtype=jnp.float32)
    featuremap = jax.random.normal(
        k_f, (N, channel // 2, Hout, Hout), dtype=jnp.float32)

    # conv1 params: weight stored as (Cout, Cin) == torch weight[:, :, 0, 0]
    w = jax.random.normal(k_w, (channel // 2, channel), dtype=jnp.float32) * 0.1
    b = jax.random.normal(k_b, (channel // 2,), dtype=jnp.float32) * 0.1

    out = upsample_forward(x, featuremap, w, b)
    out = jax.block_until_ready(out)
    assert out.shape == (N, channel // 2 + channel // 2, Hout, Hout), out.shape

    # pure-JAX reference of the PyTorch forward (upsample -> conv1x1 -> concat)
    idx_h = (jnp.arange(Hout) * Hin) // Hout
    idx_w = (jnp.arange(Hout) * Win) // Hout
    x_up = x[:, :, idx_h[:, None], idx_w[None, :]]
    y_ref = jnp.einsum("nchw,dc->ndhw", x_up, w) + b[None, :, None, None]
    ref = jnp.concatenate([y_ref, featuremap], axis=1)
    assert jnp.allclose(out, ref, atol=1e-5, rtol=1e-5), float(
        jnp.max(jnp.abs(out - ref)))

    print("KERNEL_OK")
</pallas_src>

<mosaic_0001>
module attributes {stable_mosaic.version = 11 : i64} {
  func.func @_upsample_conv_concat_kernel(%arg0: i32, %arg1: i32, %arg2: memref<2x4xf32, #tpu.memory_space<vmem>>, %arg3: memref<2x1xf32, #tpu.memory_space<vmem>>, %arg4: memref<1x4x64xf32, #tpu.memory_space<vmem>>, %arg5: memref<1x64x256xf32, #tpu.memory_space<vmem>>, %arg6: memref<1x2x256xf32, #tpu.memory_space<vmem>>, %arg7: memref<1x4x256xf32, #tpu.memory_space<vmem>>) attributes {dimension_semantics = [#tpu.dimension_semantics<parallel>, #tpu.dimension_semantics<parallel>], iteration_bounds = array<i64: 2, 1>, scalar_prefetch = 0 : i64, scratch_operands = 0 : i64, tpu.core_type = #tpu.core_type<tc>, window_params = [{pipeline_mode = #tpu.pipeline_mode<synchronous>, transform_indices = @transform_0, window_bounds = array<i64: 2, 4>}, {pipeline_mode = #tpu.pipeline_mode<synchronous>, transform_indices = @transform_1, window_bounds = array<i64: 2, 1>}, {transform_indices = @transform_2, window_bounds = array<i64: 1, 4, 64>}, {pipeline_mode = #tpu.pipeline_mode<synchronous>, transform_indices = @transform_3, window_bounds = array<i64: 1, 64, 256>}, {transform_indices = @transform_4, window_bounds = array<i64: 1, 2, 256>}, {transform_indices = @transform_5, window_bounds = array<i64: 1, 4, 256>}]} {
    %c0 = arith.constant 0 : index
    %c0_0 = arith.constant 0 : index
    %c0_1 = arith.constant 0 : index
    %0 = vector.load %arg4[%c0, %c0_0, %c0_1] : memref<1x4x64xf32, #tpu.memory_space<vmem>>, vector<1x4x64xf32>
    %1 = vector.shape_cast %0 : vector<1x4x64xf32> to vector<4x64xf32>
    %c0_2 = arith.constant 0 : index
    %c0_3 = arith.constant 0 : index
    %2 = vector.load %arg2[%c0_2, %c0_3] : memref<2x4xf32, #tpu.memory_space<vmem>>, vector<2x4xf32>
    %cst = arith.constant dense<0.000000e+00> : vector<2x64xf32>
    %3 = tpu.matmul %2, %1, %cst {dimension_numbers = #tpu.dot_dimension_numbers<[1], [0], [0], [1], [0, 0, 1, 1], [], []>} : vector<2x4xf32>, vector<4x64xf32>, vector<2x64xf32> -> vector<2x64xf32>
    %c0_4 = arith.constant 0 : index
    %c0_5 = arith.constant 0 : index
    %4 = vector.load %arg3[%c0_4, %c0_5] : memref<2x1xf32, #tpu.memory_space<vmem>>, vector<2x1xf32>
    %5 = vector.broadcast %4 : vector<2x1xf32> to vector<2x64xf32>
    %6 = arith.addf %3, %5 : vector<2x64xf32>
    %c0_6 = arith.constant 0 : index
    %c0_7 = arith.constant 0 : index
    %c0_8 = arith.constant 0 : index
    %7 = vector.load %arg5[%c0_6, %c0_7, %c0_8] : memref<1x64x256xf32, #tpu.memory_space<vmem>>, vector<1x64x256xf32>
    %8 = vector.shape_cast %7 : vector<1x64x256xf32> to vector<64x256xf32>
    %cst_9 = arith.constant dense<0.000000e+00> : vector<2x256xf32>
    %9 = tpu.matmul %6, %8, %cst_9 {dimension_numbers = #tpu.dot_dimension_numbers<[1], [0], [0], [1], [0, 0, 1, 1], [], []>} : vector<2x64xf32>, vector<64x256xf32>, vector<2x256xf32> -> vector<2x256xf32>
    %c0_10 = arith.constant 0 : index
    %c0_11 = arith.constant 0 : index
    %c0_12 = arith.constant 0 : index
    %10 = vector.load %arg7[%c0_10, %c0_11, %c0_12] : memref<1x4x256xf32, #tpu.memory_space<vmem>>, vector<1x2x256xf32>
    %11 = vector.shape_cast %10 : vector<1x2x256xf32> to vector<2x256xf32>
    %12 = vector.shape_cast %9 : vector<2x256xf32> to vector<1x2x256xf32>
    tpu.vector_store %arg7[%c0_10, %c0_11, %c0_12], %12 {strides = array<i32>} : memref<1x4x256xf32, #tpu.memory_space<vmem>>, vector<1x2x256xf32>,
    %c0_13 = arith.constant 0 : index
    %c0_14 = arith.constant 0 : index
    %c0_15 = arith.constant 0 : index
    %13 = vector.load %arg6[%c0_13, %c0_14, %c0_15] : memref<1x2x256xf32, #tpu.memory_space<vmem>>, vector<1x2x256xf32>
    %14 = vector.shape_cast %13 : vector<1x2x256xf32> to vector<2x256xf32>
    %c0_16 = arith.constant 0 : index
    %c2 = arith.constant 2 : index
    %c0_17 = arith.constant 0 : index
    %15 = vector.load %arg7[%c0_16, %c2, %c0_17] : memref<1x4x256xf32, #tpu.memory_space<vmem>>, vector<1x2x256xf32>
    %16 = vector.shape_cast %15 : vector<1x2x256xf32> to vector<2x256xf32>
    %17 = vector.shape_cast %14 : vector<2x256xf32> to vector<1x2x256xf32>
    tpu.vector_store %arg7[%c0_16, %c2, %c0_17], %17 {strides = array<i32>} : memref<1x4x256xf32, #tpu.memory_space<vmem>>, vector<1x2x256xf32>,
    return
  }
  func.func @transform_0(%arg0: i32, %arg1: i32) -> (i32, i32) {
    %c0_i32 = arith.constant 0 : i32
    %c0_i32_0 = arith.constant 0 : i32
    %c0_i32_1 = arith.constant 0 : i32
    return %c0_i32, %c0_i32_0 : i32, i32
  }
  func.func @transform_1(%arg0: i32, %arg1: i32) -> (i32, i32) {
    %c0_i32 = arith.constant 0 : i32
    %c0_i32_0 = arith.constant 0 : i32
    %c0_i32_1 = arith.constant 0 : i32
    return %c0_i32, %c0_i32_0 : i32, i32
  }
  func.func @transform_2(%arg0: i32, %arg1: i32) -> (i32, i32, i32) {
    %c0_i32 = arith.constant 0 : i32
    %c0_i32_0 = arith.constant 0 : i32
    return %arg0, %c0_i32, %arg1 : i32, i32, i32
  }
  func.func @transform_3(%arg0: i32, %arg1: i32) -> (i32, i32, i32) {
    %c0_i32 = arith.constant 0 : i32
    %c0_i32_0 = arith.constant 0 : i32
    %c0_i32_1 = arith.constant 0 : i32
    %c0_i32_2 = arith.constant 0 : i32
    return %c0_i32, %c0_i32_0, %c0_i32_1 : i32, i32, i32
  }
  func.func @transform_4(%arg0: i32, %arg1: i32) -> (i32, i32, i32) {
    %c0_i32 = arith.constant 0 : i32
    %c0_i32_0 = arith.constant 0 : i32
    return %arg0, %c0_i32, %arg1 : i32, i32, i32
  }
  func.func @transform_5(%arg0: i32, %arg1: i32) -> (i32, i32, i32) {
    %c0_i32 = arith.constant 0 : i32
    %c0_i32_0 = arith.constant 0 : i32
    return %arg0, %c0_i32, %arg1 : i32, i32, i32
  }
}

</mosaic_0001>

<bundles_post_ra>
// kernel: tpu_custom_call.1
= control target key start
LH: loop header
LB: loop body
LE: loop exit
PB: predicated region body
PF: predicated region fallthrough
CT: control target
= control target key end

     0   :  { %s1098_s0 = inlined_call_operand.vmem [shape: f32[2,4], index: 0, kind: input, shape index: {}]   ;;  %s1099_s1 = inlined_call_operand.vmem [shape: f32[2,1], index: 1, kind: input, shape index: {}]   ;;  %s1100_s2 = inlined_call_operand.hbm [shape: f32[2,4,64], index: 2, kind: input, shape index: {}]   ;;  %s1101_s3 = inlined_call_operand.hbm [shape: f32[1,64,256], index: 3, kind: input, shape index: {}]   ;;  %s1102_s4 = inlined_call_operand.vmem [shape: f32[2,2,256], index: 4, kind: input, shape index: {}]   ;;  %s1103_s5 = inlined_call_operand.hbm [shape: f32[2,4,256], index: 5, kind: output, shape index: {}]  }
   0x1   :  { %1106 = sst [smem:[#allocation12_spill]] %s1101_s3 }
   0x2   :  { %10 = vsyncpa [#allocation3], 0 }
   0x3   :  { %12 = vsyncpa [#allocation3 + $0x1], 0 }
   0x4   :  { %13 = vsyncpa [#allocation6], 0 }
   0x5   :  { %14 = vsyncpa [#allocation4], 0 }
   0x6   :  { %16 = vsyncpa [#allocation4 + $0x1], 0  ;;  %s919_s18 = smov 0   ;;  %s921_s19 = smov 0  }
   0x7   :  { %s923_s20 = smov 0   ;;  %s925_s21 = smov 0  }
   0x8   :  { %s927_s22 = smov 0   ;;  %s929_s23 = smov 0  }
   0x9 LB: > { %s630_s24 = sadd.s32 4294967295, %s879_s23   ;;  %s631_s25 = sadd.s32 4294967294, %s879_s23   ;;  %s879_s23 = sphi %s929_s23, %s22_s23   ;;  %s875_s22 = sphi %s927_s22, %s1126_s22   ;;  %s871_s21 = sphi %s925_s21, %s1125_s21   ;;  %s867_s20 = sphi %s923_s20, %s1124_s20   ;;  %s863_s19 = sphi %s921_s19, %s1123_s19   ;;  %s859_s18 = sphi %s919_s18, %s1122_s18  }
   0xa   : > { %p98_p0 = scmp.ne.s32.totalorder %s863_s19, %s859_s18  ;;  %p953_p1 = scmp.eq.s32.totalorder %s630_s24, 0 }
   0xb   : > { %p957_p2 = scmp.eq.s32.totalorder %s630_s24, 1  ;;  %p179_p3 = scmp.eq.s32.totalorder %s631_s25, 1 }
   0xc   : > { %p963_p4 = por %p953_p1, %p98_p0  ;;  %p632_p5 = scmp.ge.s32.totalorder %s879_s23, 1 }
   0xd   : > { %p968_p6 = por %p179_p3, %p98_p0  ;;  %p186_p7 = scmp.lt.s32.totalorder %s879_s23, 3 }
   0xe   : > { %s1109_s28 = scalar_select %p963_p4, 1, 0 }
   0xf   : > { %s1110_s29 = scalar_select %p968_p6, 1, 0 }
  0x10   : > { %p973_p8 = pnand %p632_p5, %p186_p7  ;;  %s881_s6 = smov [#allocation5]  }
  0x11   : > { %s204_s7 = sshll.u32 %s881_s6, 4  ;;  %s34_s9 = sadd.s32 1, %s875_s22  ;;  %s205_s7 = int_to_ptr.vmem [resolvable:$true] %s204_s7 }
  0x12   : > { %p669_p9 = pneg %p973_p8  ;;  %s752_s10 = scalar_lea.vmem %s205_s7, 2048 }
  0x13   : > { %p753_p13 = scmp.ne.s32.totalorder %s205_s7, %s752_s10  ;;  %p760_p5 = scmp.lt.s32.totalorder %s205_s7, %s205_s7 }
  0x14   : > { %p982_p11 = pnand %p669_p9, %p953_p1  ;;  %p761_p7 = scmp.lt.s32.totalorder %s752_s10, %s752_s10 }
  0x16   : > { %p743_p12 = pneg %p982_p11  ;;  %p762_p6 = por %p761_p7, %p760_p5 }
  0x18   : > { %p755_p0 = pnand %p753_p13, %p743_p12 }
  0x1a   : > { %p756_p3 = pneg %p755_p0 }
  0x1c   : > { %p763_p4 = pnand %p762_p6, %p756_p3 }
  0x1e   : > { %766 = shalt.err (!%p763_p4)
}
  0x1f   : > { %s882_s11 = smov 256   ;;  %s883_s12 = smov 16  }
  0x20   : > { %s1113_s3 = sld [smem:[#allocation12_spill]]  ;;  %p36_p6 = scmp.ge.s32.totalorder %s34_s9, 2 }
  0x21   : > { %s85_s15 = sadd.s32 1, %s867_s20  ;;  %p92_p4 = scmp.ne.s32.totalorder %s867_s20, %s863_s19 }
  0x22   : > { %p93_p9 = scmp.eq.s32.totalorder %s879_s23, 0  ;;  %s1128_s9 = smov (%p36_p6, %s34_s9), 0 }
  0x23   : > { %1114 = sst [smem:[#allocation11_spill]] %s1128_s9  ;;  %p1006_p13 = por %p957_p2, %p92_p4 }
  0x24   : > { %p1000_p12 = por %p93_p9, %p92_p4  ;;  %s80_s24 = ssub.s32 %s875_s22, %s1128_s9 }
  0x25   : > { %p682_p0 = scmp.lt.s32.totalorder %s879_s23, 2  ;;  %s218_s25 = sand.u32 1, %s867_s20  }
  0x26   : > { %672 = dma.hbm_to_vmem [thread:$0]  (!%p982_p11), %s1113_s3, 2048, %s205_s7, [#allocation6], %s882_s11, %s882_s11, %s883_s12  }
  0x27   : > { %p83_p11 = scmp.eq.s32.totalorder %s80_s24, 0  ;;  %s635_s6 = sshll.u32 %s218_s25, 2 }
  0x28   : > { %s636_s8 = sshll.u32 %s875_s22, 6  ;;  %s222_s13 = scalar_lea.vmem [#allocation2], %s635_s6 }
  0x29   : > { %s1015_s7 = scalar_select %p83_p11, %s867_s20, %s85_s15  }
  0x2a   : > { %s228_s12 = scalar_lea.hbm %s1100_s2, %s636_s8  ;;  %s230_s14 = sshll.u32 %s222_s13, 4  ;;  %s231_s14 = int_to_ptr.vmem [resolvable:$true] %s230_s14 }
  0x2b   : > { %p1023_p2 = pnand %p682_p0, %p1000_p12  ;;  %s219_s3 = scalar_lea.sflag [#allocation3], %s218_s25 }
  0x2c   : > { %s780_s24 = scalar_lea.vmem %s231_s14, 64  ;;  %s884_s15 = smov [#allocation2]  }
  0x2d   : > { %p769_p3 = pneg %p1023_p2  ;;  %p781_p5 = scmp.ne.s32.totalorder %s231_s14, %s780_s24 }
  0x2e   : > { %s785_s9 = sshll.u32 %s884_s15, 4  ;;  %s786_s9 = int_to_ptr.vmem [resolvable:$false] %s785_s9 }
  0x2f   : > { %p783_p7 = pnand %p781_p5, %p769_p3  ;;  %s787_s8 = scalar_lea.vmem %s786_s9, 128 }
  0x30   : > { %p788_p4 = scmp.lt.s32.totalorder %s231_s14, %s786_s9  ;;  %p789_p9 = scmp.lt.s32.totalorder %s787_s8, %s780_s24 }
  0x31   : > { %p784_p6 = pneg %p783_p7 }
  0x32   : > { %p790_p11 = por %p789_p9, %p788_p4 }
  0x34   : > { %p791_p10 = pnand %p790_p11, %p784_p6 }
  0x36   : > { %794 = shalt.err (!%p791_p10)
}
  0x37   : > { %676 = dma.hbm_to_vmem [thread:$0]  (!%p1023_p2), %s228_s12, 64, %s231_s14, %s219_s3  }
  0x38   : > { %252 = sbr.rel (%p973_p8) target bundleno = 473 (0x1d9), region = 40  ;;  %s1034_s16 = sand.u32 (!%p973_p8), 1, %s863_s19  }
  0x39   : > { %s638_s25 = sshll.u32 (!%p973_p8), %s1034_s16, 2  ;;  %s255_s6 = scalar_lea.sflag (!%p973_p8), [#allocation3], %s1034_s16 }
  0x3a   : > { %s258_s10 = scalar_lea.vmem (!%p973_p8), [#allocation2], %s638_s25  ;;  %p1118_p12 = scmp.ne.s32.totalorder (!%p973_p8), %s1109_s28, 0 }
  0x3d   : > { %846 = dma.done.wait (%p1118_p12), %s255_s6, 64  }
  0x3e   : > { %848 = vsyncadd (%p1118_p12), %s255_s6, 4294967232 }
  0x3f   : > { %850 = dma.done.wait (%p953_p1), [#allocation6], 2048  }
  0x40   : > { %852 = vsyncadd (%p953_p1), [#allocation6], 4294965248  ;;  %v885_v0 = vmov 0.0   ;;  %vm886_vm0 = vmmov 0   ;;  %v887_v1 = vmov 0   ;;  %vm321_vm1 = vcmask 1043456  }
  0x41   : > { %656 = vmatprep.subr.mxu0 %v885_v0  ;;  %658 = vmatprep.mubr.msk.f32.mxu0 %vm886_vm0, %v885_v0  ;;  %vm317_vm2 = vcmask 31744   ;;  %v309_v2 = vld [vmem:[%s258_s10] sm:$0xf]  ;;  %v409_v6 = vld [vmem:[#allocation5 + $0x70] sm:$0xff]  ;;  %v408_v7 = vld [vmem:[#allocation5 + $0x68] sm:$0xff]  ;;  %vm411_vm3 = vcmask 523264  }
  0x42   : > { %739 = vset.pattern.permute.xlu0 %v887_v1  ;;  %479 = vmatprep.mubr.f32.mxu1 %v885_v0  ;;  %v310_v3 = vld [vmem:[%s1098_s0] sm:$0x3]  ;;  %v407_v8 = vld [vmem:[#allocation5 + $0x60] sm:$0xff]  ;;  %v405_v10 = vld [vmem:[#allocation5 + $0x50] sm:$0xff]  ;;  %p299_p1 = scmp.lt.s32.totalorder %s871_s21, 1  ;;  %s640_s11 = sshll.u32 %s1034_s16, 3 }
  0x43   : > { %v311_v4 = vld [vmem:[%s1099_s1] sm:$0x3]  ;;  %657 = vmatpush3.msk.msra.mxu0 %vm321_vm1, %v309_v2  ;;  %v404_v11 = vld [vmem:[#allocation5 + $0x48] sm:$0xff]  ;;  %v403_v12 = vld [vmem:[#allocation5 + $0x40] sm:$0xff]  ;;  %s297_s24 = scalar_lea.vmem [#allocation7], %s640_s11  ;;  %s653_s15 = sshll.u32 %s871_s21, 7 }
  0x44   : > { %314 = vperm.xlu0 %739, %v311_v4   ;;  %v410_v5 = vld [vmem:[#allocation5 + $0x78] sm:$0xff]  ;;  %659 = vmatmul.mubr.msk.f32.vlgmr.msra.gmra.mxu0 %vm317_vm2, %v310_v3  ;;  %v401_v14 = vld [vmem:[#allocation5 + $0x30] sm:$0xff]  ;;  %v400_v15 = vld [vmem:[#allocation5 + $0x28] sm:$0xff]  ;;  %s300_s26 = scalar_select %p299_p1, %s871_s21, 1 }
  0x45   : > { %431 = vmatprep.subr.mxu1 %v410_v5  ;;  %v406_v9 = vld [vmem:[#allocation5 + $0x58] sm:$0xff]  ;;  %v399_v16 = vld [vmem:[#allocation5 + $0x20] sm:$0xff]  ;;  %v397_v18 = vld [vmem:[#allocation5 + $0x10] sm:$0xff]  ;;  %s520_s8 = sshll.u32 %s297_s24, 4  ;;  %s518_s10 = scalar_lea.hbm %s1103_s5, %s653_s15  ;;  %s521_s8 = int_to_ptr.vmem [resolvable:$true] %s520_s8 }
  0x46   : > { %432 = vmatpush1.msra.mxu1 %v409_v6  ;;  %v402_v13 = vld [vmem:[#allocation5 + $0x38] sm:$0xff]  ;;  %v396_v19 = vld [vmem:[#allocation5 + $0x8] sm:$0xff]  ;;  %v395_v20 = vld [vmem:[#allocation5] sm:$0xff]  ;;  %s652_s12 = sshll.u32 %s300_s26, 2  ;;  %s504_s3 = scalar_lea.sflag [#allocation4], %s1034_s16 }
  0x47   : > { %433 = vmatprep.subr.mxu1 %v408_v7  ;;  %v398_v17 = vld [vmem:[#allocation5 + $0x18] sm:$0xff]  ;;  %s306_s27 = scalar_lea.vmem %s1102_s4, %s652_s12  ;;  %s795_s30 = scalar_lea.vmem %s521_s8, 128 }
  0x48   : > { %434 = vmatpush1.msra.mxu1 %v407_v8  ;;  %v740_v25 = vld [vmem:[%s306_s27] ss:$0 sps:$4 sm:$0xff]   ;;  %p796_p8 = scmp.ne.s32.totalorder %s521_s8, %s795_s30  ;;  %s888_s28 = smov [#allocation7]  }
  0x49   : > { %435 = vmatprep.subr.mxu1 %v406_v9  ;;  %646 = vst.sshfl [vmem:[%s297_s24] sm:$0xf0 pattern:$0x76325410] %v740_v25  ;;  %s799_s9 = sshll.u32 %s888_s28, 4  ;;  %s800_s9 = int_to_ptr.vmem [resolvable:$false] %s799_s9 }
  0x4a   : > { %436 = vmatpush1.msra.mxu1 %v405_v10  ;;  %p797_p10 = pnand %p796_p8, %p1006_p13  ;;  %s801_s26 = scalar_lea.vmem %s800_s9, 256 }
  0x4b   : > { %437 = vmatprep.subr.mxu1 %v404_v11  ;;  %p802_p2 = scmp.lt.s32.totalorder %s521_s8, %s800_s9  ;;  %p803_p3 = scmp.lt.s32.totalorder %s801_s26, %s795_s30 }
  0x4c   : > { %438 = vmatpush1.msra.mxu1 %v403_v12  ;;  %p798_p0 = pneg %p797_p10 }
  0x4d   : > { %439 = vmatprep.subr.mxu1 %v402_v13  ;;  %p804_p5 = por %p803_p3, %p802_p2 }
  0x4e   : > { %440 = vmatpush1.msra.mxu1 %v401_v14 }
  0x4f   : > { %441 = vmatprep.subr.mxu1 %v400_v15  ;;  %p805_p7 = pnand %p804_p5, %p798_p0 }
  0x50   : > { %442 = vmatpush1.msra.mxu1 %v399_v16 }
  0x51   : > { %443 = vmatprep.subr.mxu1 %v398_v17 }
  0x52   : > { %444 = vmatpush1.msra.mxu1 %v397_v18 }
  0x53   : > { %445 = vmatprep.subr.mxu1 %v396_v19 }
  0x54   : > { %446 = vmatpush1.msra.mxu1 %v395_v20 }
  0xbf   : > { %v315_v21 = vpop.permute.xlu0 %314 }
 0x104   : > { %v391_v22 = vpop.f32.mrf.mxu0 }
 0x105   : > { %v392_v23 = vadd.f32 %v391_v22, %v315_v21 }
 0x106   : > { %v660_v24 = vpop.f32.mrf.mxu0 }
 0x107   : > { %645 = vmatmul.mubr.msk.f32.vlgmr.msra.gmra.mxu1 %vm411_vm3, %v392_v23 }
 0x1c7   : > { %v481_v26 = vpop.f32.mrf.mxu1 }
 0x1c9   : > { %v483_v27 = vpop.f32.mrf.mxu1 }
 0x1ca   : > { %v488_v28 = vcombine.low %v481_v26, %v483_v27 }
 0x1cc   : > { %490 = vst [vmem:[%s297_s24] sm:$0x33] %v488_v28 }
 0x1cd   : > { %808 = shalt.err (!%p805_p7)
}
 0x1ce   : > { %s809_s21 = scalar_lea.hbm %s518_s10, 128  ;;  %s813_s12 = scalar_lea.hbm %s1103_s5, 256 }
 0x1cf   : > { %p810_p6 = scmp.ne.s32.totalorder %s518_s10, %s809_s21  ;;  %p814_p11 = scmp.lt.s32.totalorder %s518_s10, %s1103_s5 }
 0x1d0   : > { %p815_p12 = scmp.lt.s32.totalorder %s813_s12, %s809_s21 }
 0x1d1   : > { %p811_p4 = pnand %p810_p6, %p1006_p13 }
 0x1d2   : > { %p816_p1 = por %p815_p12, %p814_p11 }
 0x1d3   : > { %p812_p9 = pneg %p811_p4 }
 0x1d5   : > { %p817_p8 = pnand %p816_p1, %p812_p9 }
 0x1d7   : > { %820 = shalt.err (!%p817_p8)
}
 0x1d8   : > { %667 = dma.vmem_to_hbm [thread:$0]  (%p1006_p13), %s521_s8, 128, %s518_s10, %s504_s3  }
 0x1d9 PF: > { %s532_s27 = sand.u32 1, %s859_s18   ;;  %p1119_p10 = scmp.ne.s32.totalorder %s1110_s29, 0 }
 0x1da   : > { %p1120_p0 = scmp.ge.s32.totalorder %s879_s23, 2  ;;  %s533_s24 = scalar_lea.sflag [#allocation4], %s532_s27 }
 0x1dc   : > { %p678_p2 = pnand %p1120_p0, %p1119_p10 }
 0x1de   : > { %p679_p3 = pneg %p678_p2 }
 0x1e0   : > { %854 = dma.done.wait (%p679_p3), %s533_s24, 128  }
 0x1e1   : > { %856 = vsyncadd (%p679_p3), %s533_s24, 4294967168  ;;  %s22_s23 = sadd.s32 1, %s879_s23   ;;  %s1121_s17 = sld [smem:[#allocation11_spill]] }
 0x1e2   : > { %p19_p5 = scmp.ge.s32.totalorder %s22_s23, 4   ;;  %s1122_s18 = smov %s863_s19 }
 0x1e3   : > { %s1123_s19 = smov %s867_s20  ;;  %s1124_s20 = smov %s1015_s7 }
 0x1e4   : > { %s1125_s21 = smov %s875_s22  ;;  %21 = sbr.rel (!%p19_p5) target bundleno = 9 (0x9), region = 92 }
 0x1e7   : > { %s1126_s22 = smov %s1121_s17 }
 0x1e9   :  { %538 = vsyncpa [#allocation3], 1 }
 0x1ea   :  { %540 = vsyncpa [#allocation3 + $0x1], 1 }
 0x1eb   :  { %541 = vsyncpa [#allocation6], 1 }
 0x1ec   :  { %542 = vsyncpa [#allocation4], 1 }
 0x1ed   :  { %544 = vsyncpa [#allocation4 + $0x1], 1 }

</bundles_post_ra>
